<compile_context>
chip_gen: v5e
topology: v5e:2x2
jax: 0.10.0
libtpu: 0.0.40
codegen_flags: <defaults>
</compile_context>

<pallas_src>
import functools

import jax
import jax.numpy as jnp
from jax.experimental import pallas as pl
from jax.experimental.pallas import tpu as pltpu


def _round_up(x, m):
    return (x + m - 1) // m * m


def _num_tensorcores():
    """2 batch tiles only for v7x-class chips (2 TCs/chip); otherwise 1."""
    try:
        kind = jax.devices()[0].device_kind.lower()
    except Exception:  # pragma: no cover - defensive
        return 1
    return 2 if "v7" in kind else 1


def shared_network_kernel(x_ref, w1_ref, b1_ref, w2_ref, b2_ref, o_ref):
    """One batch tile: (TM, S) rows through fc1+ReLU then fc2+ReLU."""
    # fc1: (TM, S) @ (S, H) on the MXU, bf16 operands, f32 accumulation.
    h = jnp.dot(x_ref[...].astype(jnp.bfloat16), w1_ref[...],
                preferred_element_type=jnp.float32)
    h = jnp.maximum(h + b1_ref[...], 0.0)

    # fc2: (TM, H) @ (H, H) on the MXU, bf16 operands, f32 accumulation.
    y = jnp.dot(h.astype(jnp.bfloat16), w2_ref[...],
                preferred_element_type=jnp.float32)
    y = y + b2_ref[...]
    o_ref[...] = jnp.maximum(y, 0.0).astype(o_ref.dtype)


@functools.partial(jax.jit, static_argnames=("num_tiles",))
def _shared_network_forward(x, w1_bf16, b1, w2_bf16, b2, *, num_tiles):
    """x: (B, S) f32; w1_bf16: (S, H) bf16; w2_bf16: (H, H) bf16;
    b1/b2: (1, H) f32.  Returns (B, H) f32."""
    B, S = x.shape
    H = w1_bf16.shape[1]

    # Worst-case padding is 8*num_tiles - 1 rows (not tm - 1).
    Bp = _round_up(B, 8 * num_tiles)
    tm = Bp // num_tiles
    if Bp != B:
        x = jnp.pad(x, ((0, Bp - B), (0, 0)))

    out = pl.pallas_call(
        shared_network_kernel,
        out_shape=jax.ShapeDtypeStruct((Bp, H), jnp.float32),
        grid_spec=pltpu.PrefetchScalarGridSpec(
            num_scalar_prefetch=0,
            grid=(num_tiles,),
            in_specs=[
                pl.BlockSpec((tm, S), lambda i: (i, 0)),   # x: tiled over batch
                pl.BlockSpec((S, H), lambda i: (0, 0)),    # W1: VMEM-resident
                pl.BlockSpec((1, H), lambda i: (0, 0)),    # b1: VMEM-resident
                pl.BlockSpec((H, H), lambda i: (0, 0)),    # W2: VMEM-resident
                pl.BlockSpec((1, H), lambda i: (0, 0)),    # b2: VMEM-resident
            ],
            out_specs=pl.BlockSpec((tm, H), lambda i: (i, 0)),
        ),
        compiler_params=pltpu.CompilerParams(
            # No-op when grid=(1,); shards the 2 batch tiles across both TCs
            # on v7x.  Total VMEM < 1 MiB, so no vmem_limit_bytes needed.
            dimension_semantics=("parallel",),
        ),
    )(x, w1_bf16, b1, w2_bf16, b2)
    return out[:B]


def shared_network_forward(x, w1_bf16, b1, w2_bf16, b2, *, num_tiles=None):
    B = x.shape[0]
    if num_tiles is None:
        num_tiles = _num_tensorcores()
    # Don't split tiny batches across cores; each tile needs >= 8 rows.
    num_tiles = max(1, min(num_tiles, B // 8)) if B >= 8 else 1
    return _shared_network_forward(x, w1_bf16, b1, w2_bf16, b2,
                                   num_tiles=num_tiles)


def init_linear_params(key, in_features, out_features):
    # Match torch.nn.Linear default init: U(-1/sqrt(fan_in), 1/sqrt(fan_in)).
    kw, kb = jax.random.split(key)
    bound = 1.0 / jnp.sqrt(jnp.float32(in_features))
    # Store weight already transposed: (in_features, out_features).
    w_t = jax.random.uniform(kw, (in_features, out_features), jnp.float32,
                             minval=-bound, maxval=bound)
    b = jax.random.uniform(kb, (1, out_features), jnp.float32,
                           minval=-bound, maxval=bound)
    return w_t, b


if __name__ == "__main__":
    state_dim = 4        # CartPole-v1 observation dim (fixed by the module)
    hidden_dim = 128     # fixed by the module
    batch = 32           # small batch; 2 parallel tiles on v7x, 1 step else

    key = jax.random.PRNGKey(0)
    k_x, k_l1, k_l2 = jax.random.split(key, 3)

    x = jax.random.normal(k_x, (batch, state_dim), jnp.float32)
    w1_t, b1 = init_linear_params(k_l1, state_dim, hidden_dim)
    w2_t, b2 = init_linear_params(k_l2, hidden_dim, hidden_dim)

    # Cast weights to bf16 ONCE at init (not per call).
    w1_bf16 = w1_t.astype(jnp.bfloat16)
    w2_bf16 = w2_t.astype(jnp.bfloat16)

    out = jax.block_until_ready(
        shared_network_forward(x, w1_bf16, b1, w2_bf16, b2))

    # Reference with matched precision (bf16 operands, f32 accumulate) plus a
    # loose check against pure-f32 math.
    h_bf16 = jnp.maximum(
        jnp.dot(x.astype(jnp.bfloat16), w1_bf16,
                preferred_element_type=jnp.float32) + b1, 0.0)
    ref_bf16 = jnp.maximum(
        jnp.dot(h_bf16.astype(jnp.bfloat16), w2_bf16,
                preferred_element_type=jnp.float32) + b2, 0.0)
    h_f32 = jnp.maximum(x @ w1_t + b1, 0.0)
    ref_f32 = jnp.maximum(h_f32 @ w2_t + b2, 0.0)

    assert out.shape == (batch, hidden_dim)
    assert out.dtype == jnp.float32
    assert jnp.allclose(out, ref_bf16, atol=1e-2, rtol=1e-2)
    assert jnp.allclose(out, ref_f32, atol=5e-2, rtol=5e-2)

    print("KERNEL_OK")
</pallas_src>

<mosaic_0001>
module attributes {stable_mosaic.version = 11 : i64} {
  func.func @shared_network_kernel(%arg0: i32, %arg1: memref<32x4xf32, #tpu.memory_space<vmem>>, %arg2: memref<4x128xbf16, #tpu.memory_space<vmem>>, %arg3: memref<1x128xf32, #tpu.memory_space<vmem>>, %arg4: memref<128x128xbf16, #tpu.memory_space<vmem>>, %arg5: memref<1x128xf32, #tpu.memory_space<vmem>>, %arg6: memref<32x128xf32, #tpu.memory_space<vmem>>) attributes {dimension_semantics = [#tpu.dimension_semantics<parallel>], iteration_bounds = array<i64: 1>, scalar_prefetch = 0 : i64, scratch_operands = 0 : i64, tpu.core_type = #tpu.core_type<tc>, window_params = [{transform_indices = @transform_0, window_bounds = array<i64: 32, 4>}, {pipeline_mode = #tpu.pipeline_mode<synchronous>, transform_indices = @transform_1, window_bounds = array<i64: 4, 128>}, {pipeline_mode = #tpu.pipeline_mode<synchronous>, transform_indices = @transform_2, window_bounds = array<i64: 1, 128>}, {pipeline_mode = #tpu.pipeline_mode<synchronous>, transform_indices = @transform_3, window_bounds = array<i64: 128, 128>}, {pipeline_mode = #tpu.pipeline_mode<synchronous>, transform_indices = @transform_4, window_bounds = array<i64: 1, 128>}, {transform_indices = @transform_5, window_bounds = array<i64: 32, 128>}]} {
    %c0 = arith.constant 0 : index
    %c0_0 = arith.constant 0 : index
    %0 = vector.load %arg1[%c0, %c0_0] : memref<32x4xf32, #tpu.memory_space<vmem>>, vector<32x4xf32>
    %1 = arith.truncf %0 : vector<32x4xf32> to vector<32x4xbf16>
    %c0_1 = arith.constant 0 : index
    %c0_2 = arith.constant 0 : index
    %2 = vector.load %arg2[%c0_1, %c0_2] : memref<4x128xbf16, #tpu.memory_space<vmem>>, vector<4x128xbf16>
    %cst = arith.constant dense<0.000000e+00> : vector<32x128xf32>
    %3 = tpu.matmul %1, %2, %cst {dimension_numbers = #tpu.dot_dimension_numbers<[1], [0], [0], [1], [0, 0, 1, 1], [], []>} : vector<32x4xbf16>, vector<4x128xbf16>, vector<32x128xf32> -> vector<32x128xf32>
    %c0_3 = arith.constant 0 : index
    %c0_4 = arith.constant 0 : index
    %4 = vector.load %arg3[%c0_3, %c0_4] : memref<1x128xf32, #tpu.memory_space<vmem>>, vector<1x128xf32>
    %5 = vector.broadcast %4 : vector<1x128xf32> to vector<32x128xf32>
    %6 = arith.addf %3, %5 : vector<32x128xf32>
    %cst_5 = arith.constant 0.000000e+00 : f32
    %7 = vector.broadcast %cst_5 : f32 to vector<32x128xf32>
    %8 = arith.maximumf %6, %7 : vector<32x128xf32>
    %9 = arith.truncf %8 : vector<32x128xf32> to vector<32x128xbf16>
    %c0_6 = arith.constant 0 : index
    %c0_7 = arith.constant 0 : index
    %10 = vector.load %arg4[%c0_6, %c0_7] : memref<128x128xbf16, #tpu.memory_space<vmem>>, vector<128x128xbf16>
    %cst_8 = arith.constant dense<0.000000e+00> : vector<32x128xf32>
    %11 = tpu.matmul %9, %10, %cst_8 {dimension_numbers = #tpu.dot_dimension_numbers<[1], [0], [0], [1], [0, 0, 1, 1], [], []>} : vector<32x128xbf16>, vector<128x128xbf16>, vector<32x128xf32> -> vector<32x128xf32>
    %c0_9 = arith.constant 0 : index
    %c0_10 = arith.constant 0 : index
    %12 = vector.load %arg5[%c0_9, %c0_10] : memref<1x128xf32, #tpu.memory_space<vmem>>, vector<1x128xf32>
    %13 = vector.broadcast %12 : vector<1x128xf32> to vector<32x128xf32>
    %14 = arith.addf %11, %13 : vector<32x128xf32>
    %cst_11 = arith.constant 0.000000e+00 : f32
    %15 = vector.broadcast %cst_11 : f32 to vector<32x128xf32>
    %16 = arith.maximumf %14, %15 : vector<32x128xf32>
    %c0_12 = arith.constant 0 : index
    %c0_13 = arith.constant 0 : index
    %17 = vector.load %arg6[%c0_12, %c0_13] : memref<32x128xf32, #tpu.memory_space<vmem>>, vector<32x128xf32>
    tpu.vector_store %arg6[%c0_12, %c0_13], %16 {strides = array<i32>} : memref<32x128xf32, #tpu.memory_space<vmem>>, vector<32x128xf32>,
    return
  }
  func.func @transform_0(%arg0: i32) -> (i32, i32) {
    %c0_i32 = arith.constant 0 : i32
    %c0_i32_0 = arith.constant 0 : i32
    return %arg0, %c0_i32 : i32, i32
  }
  func.func @transform_1(%arg0: i32) -> (i32, i32) {
    %c0_i32 = arith.constant 0 : i32
    %c0_i32_0 = arith.constant 0 : i32
    %c0_i32_1 = arith.constant 0 : i32
    return %c0_i32, %c0_i32_0 : i32, i32
  }
  func.func @transform_2(%arg0: i32) -> (i32, i32) {
    %c0_i32 = arith.constant 0 : i32
    %c0_i32_0 = arith.constant 0 : i32
    %c0_i32_1 = arith.constant 0 : i32
    return %c0_i32, %c0_i32_0 : i32, i32
  }
  func.func @transform_3(%arg0: i32) -> (i32, i32) {
    %c0_i32 = arith.constant 0 : i32
    %c0_i32_0 = arith.constant 0 : i32
    %c0_i32_1 = arith.constant 0 : i32
    return %c0_i32, %c0_i32_0 : i32, i32
  }
  func.func @transform_4(%arg0: i32) -> (i32, i32) {
    %c0_i32 = arith.constant 0 : i32
    %c0_i32_0 = arith.constant 0 : i32
    %c0_i32_1 = arith.constant 0 : i32
    return %c0_i32, %c0_i32_0 : i32, i32
  }
  func.func @transform_5(%arg0: i32) -> (i32, i32) {
    %c0_i32 = arith.constant 0 : i32
    %c0_i32_0 = arith.constant 0 : i32
    return %arg0, %c0_i32 : i32, i32
  }
}

</mosaic_0001>

<bundles_post_ra>
// kernel: _shared_network_forward.1
= control target key start
LH: loop header
LB: loop body
LE: loop exit
PB: predicated region body
PF: predicated region fallthrough
CT: control target
= control target key end

     0   :  { %10 = vsyncpa [#allocation3], 0  ;;  %s374_s0 = inlined_call_operand.vmem [shape: f32[32,4], index: 0, kind: input, shape index: {}]   ;;  %s375_s1 = inlined_call_operand.vmem [shape: bf16[4,128], index: 1, kind: input, shape index: {}]   ;;  %s376_s2 = inlined_call_operand.vmem [shape: f32[1,128], index: 2, kind: input, shape index: {}]   ;;  %s377_s3 = inlined_call_operand.hbm [shape: bf16[128,128], index: 3, kind: input, shape index: {}]   ;;  %s378_s4 = inlined_call_operand.vmem [shape: f32[1,128], index: 4, kind: input, shape index: {}]   ;;  %s379_s5 = inlined_call_operand.hbm [shape: f32[32,128], index: 5, kind: output, shape index: {}]  }
   0x1   :  { %11 = vsyncpa [#allocation4], 0  ;;  %s22_s20 = sshll.u32 %s377_s3, 4  ;;  %s309_s21 = smov [#allocation2]   ;;  %s23_s20 = int_to_ptr.hbm [resolvable:$true] %s22_s20 }
   0x2   :  { %s24_s22 = sshll.u32 %s309_s21, 4  ;;  %s310_s23 = smov 64   ;;  %s25_s22 = int_to_ptr.vmem [resolvable:$true] %s24_s22 }
   0x3   :  { %s311_s24 = smov 4  }
   0x4   :  { %30 = dma.hbm_to_vmem [thread:$0]  %s23_s20, 1024, %s25_s22, [#allocation3], %s310_s23, %s310_s23, %s311_s24  }
   0x5   :  { %305 = dma.done.wait [#allocation3], 1024  }
   0x6   :  { %306 = vsyncadd [#allocation3], 4294966272  ;;  %vm56_vm0 = vcmask 1041408   ;;  %v44_v0 = vld [vmem:[%s375_s1] sm:$0x3]  ;;  %v39_v2 = vld [vmem:[%s374_s0 + $0x8] sm:$0xff] }
   0x7   :  { %v38_v1 = vld [vmem:[%s374_s0] sm:$0xff]  ;;  %v58_v3 = vsel %vm56_vm0, %v44_v0, 0  ;;  %v240_v5 = vld [vmem:[#allocation2 + $0x38] sm:$0xff]  ;;  %vm49_vm1 = vcmask 31744   ;;  %v239_v6 = vld [vmem:[#allocation2 + $0x30] sm:$0xff]  ;;  %s186_s14 = sshll.u32 %s379_s5, 4  ;;  %s187_s14 = int_to_ptr.hbm [resolvable:$true] %s186_s14 }
   0x8   :  { %v42_v4 = vpack.c.bf16 %v39_v2, %v38_v1  ;;  %67 = vmatpush.bf16.msra.mxu0 %v58_v3  ;;  %153 = vmatpush.bf16.msra.mxu1 %v240_v5  ;;  %v238_v7 = vld [vmem:[#allocation2 + $0x28] sm:$0xff]  ;;  %v237_v8 = vld [vmem:[#allocation2 + $0x20] sm:$0xff]  ;;  %v40_v9 = vld [vmem:[%s374_s0 + $0x10] sm:$0xff]  ;;  %s314_s15 = smov 8  }
   0x9   :  { %241 = vmatpush.bf16.msra.mxu2 %v240_v5  ;;  %v41_v10 = vld [vmem:[%s374_s0 + $0x18] sm:$0xff]  ;;  %v235_v13 = vld [vmem:[#allocation2 + $0x10] sm:$0xff]  ;;  %v234_v14 = vld [vmem:[#allocation2 + $0x8] sm:$0xff] }
   0xa   :  { %v43_v11 = vpack.c.bf16 %v41_v10, %v40_v9  ;;  %v236_v12 = vld [vmem:[#allocation2 + $0x18] sm:$0xff]  ;;  %v233_v15 = vld [vmem:[#allocation2] sm:$0xff] }
   0xb   :  { %199 = vmatmul.msk.bf16.vlgmr.msra.gmra.mxu0 %vm49_vm1, %v42_v4  ;;  %v255_v17 = vld [vmem:[%s376_s2] ss:$0 sm:$0xff]  ;;  %s312_s2 = smov [#allocation5]  }
   0xc   :  { %154 = vmatpush.bf16.msra.mxu1 %v239_v6  ;;  %v256_v31 = vld [vmem:[%s378_s4] ss:$0 sm:$0xff]  ;;  %s184_s11 = sshll.u32 %s312_s2, 4  ;;  %s313_s4 = smov 128   ;;  %s185_s11 = int_to_ptr.vmem [resolvable:$true] %s184_s11 }
   0xd   :  { %242 = vmatpush.bf16.msra.mxu2 %v239_v6 }
  0x10   :  { %155 = vmatpush.bf16.msra.mxu1 %v238_v7 }
  0x11   :  { %243 = vmatpush.bf16.msra.mxu2 %v238_v7 }
  0x14   :  { %156 = vmatpush.bf16.msra.mxu1 %v237_v8 }
  0x15   :  { %244 = vmatpush.bf16.msra.mxu2 %v237_v8 }
  0x18   :  { %157 = vmatpush.bf16.msra.mxu1 %v236_v12 }
  0x19   :  { %245 = vmatpush.bf16.msra.mxu2 %v236_v12 }
  0x1b   :  { %200 = vmatmul.msk.bf16.gmra.mxu0 %vm49_vm1, %v43_v11 }
  0x1c   :  { %158 = vmatpush.bf16.msra.mxu1 %v235_v13 }
  0x1d   :  { %246 = vmatpush.bf16.msra.mxu2 %v235_v13 }
  0x20   :  { %159 = vmatpush.bf16.msra.mxu1 %v234_v14 }
  0x21   :  { %247 = vmatpush.bf16.msra.mxu2 %v234_v14 }
  0x24   :  { %160 = vmatpush.bf16.msra.mxu1 %v233_v15 }
  0x25   :  { %248 = vmatpush.bf16.msra.mxu2 %v233_v15 }
  0x88   :  { %v69_v16 = vpop.f32.mrf.mxu0 }
  0x89   :  { %v70_v18 = vadd.f32 %v255_v17, %v69_v16 }
  0x8b   :  { %v79_v21 = vmax.f32 %v70_v18, 0.0 }
  0x90   :  { %v71_v19 = vpop.f32.mrf.mxu0 }
  0x91   :  { %v72_v20 = vadd.f32 %v255_v17, %v71_v19 }
  0x93   :  { %v80_v22 = vmax.f32 %v72_v20, 0.0 }
  0x95   :  { %v83_v23 = vpack.c.bf16 %v80_v22, %v79_v21 }
  0x97   :  { %161 = vmatmul.bf16.vlgmr.msra.gmra.mxu1 %v83_v23 }
  0x98   :  { %v74_v24 = vpop.f32.mrf.mxu0 }
  0x99   :  { %v75_v25 = vadd.f32 %v255_v17, %v74_v24 }
  0x9b   :  { %v81_v28 = vmax.f32 %v75_v25, 0.0 }
  0xa0   :  { %v76_v26 = vpop.f32.mrf.mxu0 }
  0xa1   :  { %v77_v27 = vadd.f32 %v255_v17, %v76_v26 }
  0xa3   :  { %v82_v29 = vmax.f32 %v77_v27, 0.0 }
  0xa5   :  { %v84_v30 = vpack.c.bf16 %v82_v29, %v81_v28 }
  0xa7   :  { %166 = vmatmul.bf16.vlgmr.msra.gmra.mxu2 %v84_v30 }
 0x114   :  { %v162_v32 = vpop.f32.mrf.mxu1 }
 0x115   :  { %v163_v33 = vadd.f32 %v256_v31, %v162_v32 }
 0x117   :  { %v172_v34 = vmax.f32 %v163_v33, 0.0 }
 0x119   :  { %176 = vst [vmem:[#allocation5] sm:$0xff] %v172_v34 }
 0x11c   :  { %v164_v35 = vpop.f32.mrf.mxu1 }
 0x11d   :  { %v165_v36 = vadd.f32 %v256_v31, %v164_v35 }
 0x11f   :  { %v173_v37 = vmax.f32 %v165_v36, 0.0 }
 0x121   :  { %177 = vst [vmem:[#allocation5 + $0x8] sm:$0xff] %v173_v37 }
 0x12a   :  { %v167_v38 = vpop.f32.mrf.mxu2 }
 0x12b   :  { %v168_v39 = vadd.f32 %v256_v31, %v167_v38 }
 0x12d   :  { %v174_v40 = vmax.f32 %v168_v39, 0.0 }
 0x12f   :  { %178 = vst [vmem:[#allocation5 + $0x10] sm:$0xff] %v174_v40 }
 0x132   :  { %v169_v41 = vpop.f32.mrf.mxu2 }
 0x133   :  { %v170_v42 = vadd.f32 %v256_v31, %v169_v41 }
 0x135   :  { %v175_v43 = vmax.f32 %v170_v42, 0.0 }
 0x137   :  { %179 = vst [vmem:[#allocation5 + $0x18] sm:$0xff] %v175_v43 }
 0x138   :  { %192 = dma.vmem_to_hbm [thread:$0]  %s185_s11, 512, %s187_s14, [#allocation4], %s313_s4, %s313_s4, %s314_s15  }
 0x139   :  { %307 = dma.done.wait [#allocation4], 512  }
 0x13a   :  { %308 = vsyncadd [#allocation4], 4294966784 }
 0x13b   :  { %197 = vsyncpa [#allocation3], 1 }
 0x13c   :  { %198 = vsyncpa [#allocation4], 1 }

</bundles_post_ra>
